<compile_context>
chip_gen: v7x
topology: tpu7x:2x2x1
jax: 0.10.0
libtpu: 0.0.40
codegen_flags: <defaults>
</compile_context>

<pallas_src>
import functools

import jax
import jax.numpy as jnp
from jax import lax
from jax.experimental import pallas as pl
from jax.experimental.pallas import tpu as pltpu


def _netvlad_kernel(x_ref, w_ref, cent_ref, o_ref, acc_ax, acc_as, *,
                    mxu_dtype, valid_s, tile_s, needs_mask, approx):
    # x_ref:    (1, C, TS)  spatial tile of one image, native (N,C,S) layout
    # w_ref:    (K, C)      1x1-conv weights, already in mxu_dtype (vladv1: no bias)
    # cent_ref: (K, C)      cluster centroids (f32)
    # o_ref:    (1, K, C)   fully normalized VLAD descriptor (written at s==last)
    # acc_ax:   (K, C) f32  scratch: sum_s a[k,s] * x_n[c,s]
    # acc_as:   (K, 1) f32  scratch: sum_s a[k,s]
    s_idx = pl.program_id(1)
    eps = jnp.float32(1e-12)  # F.normalize default eps (clamp_min on the norm)

    @pl.when(s_idx == 0)
    def _init():
        acc_ax[...] = jnp.zeros_like(acc_ax)
        acc_as[...] = jnp.zeros_like(acc_as)

    x_raw = x_ref[0]                              # (C, TS), input dtype
    x_m = x_raw.astype(mxu_dtype)                 # single cast feeds BOTH matmuls
    x_f = x_raw.astype(jnp.float32)               # f32 only for the norm reduction

    # Descriptor-wise L2 norm over channels (torch dim=1): per-column scale
    # only -- it is folded into the (K,TS) tensors below, x itself is not scaled.
    ssq = jnp.sum(x_f * x_f, axis=0, keepdims=True)           # (1, TS)
    if approx:
        inv_nrm = lax.rsqrt(jnp.maximum(ssq, eps * eps))      # EUP rsqrt
    else:
        inv_nrm = 1.0 / jnp.maximum(jnp.sqrt(ssq), eps)       # exact (demo path)

    # 1x1 conv on raw x: (K,C)@(C,TS) on the MXU; fold the L2 scale into the
    # small (K,TS) result (column scaling commutes with the matmul).
    logits = jnp.dot(w_ref[...], x_m,
                     preferred_element_type=jnp.float32) * inv_nrm  # (K, TS)

    # Softmax over the cluster axis (torch dim=1 of (N,K,S) == axis 0 here).
    m = jnp.max(logits, axis=0, keepdims=True)                # (1, TS)
    e = jnp.exp(logits - m)                                   # (K, TS)
    den = jnp.sum(e, axis=0, keepdims=True)                   # (1, TS)
    if approx:
        inv_den = pl.reciprocal(den, approx=True)             # EUP vrcp
    else:
        inv_den = 1.0 / den
    a = e * inv_den                                           # (K, TS) soft assignment

    if needs_mask:
        # Spatial padding (S -> multiple of 128/TS): zero the soft assignment of
        # padded columns so neither acc_as nor acc_ax sees them.  Padded x is
        # already zero, so nothing else needs masking.
        col = s_idx * tile_s + lax.broadcasted_iota(jnp.int32, a.shape, 1)
        a = jnp.where(col < valid_s, a, 0.0)

    # Aggregation: sum_s a[k,s] * x_n[c,s].  Fold inv_nrm into the small (K,TS)
    # operand and contract TS on both sides (NT dot_general, no materialized
    # transpose of the big (C,TS) tile).
    a_scaled = (a * inv_nrm).astype(mxu_dtype)                # (K, TS)
    acc_ax[...] += lax.dot_general(
        a_scaled, x_m,
        dimension_numbers=(((1,), (1,)), ((), ())),
        preferred_element_type=jnp.float32)                   # (K, C)
    acc_as[...] += jnp.sum(a, axis=1, keepdims=True)          # (K, 1)

    @pl.when(s_idx == pl.num_programs(1) - 1)
    def _finalize():
        cent = cent_ref[...].astype(jnp.float32)              # (K, C)
        vlad = acc_ax[...] - cent * acc_as[...]               # (K, C)

        # Fused intra (L2 over C per cluster) + global (L2 over flattened K*C)
        # normalization: vlad is squared/reduced once and scaled once.
        # Once-per-image finalize -> exact reciprocals are essentially free.
        inorm = jnp.sqrt(jnp.sum(vlad * vlad, axis=1, keepdims=True))  # (K, 1)
        inv_intra = 1.0 / jnp.maximum(inorm, eps)                      # (K, 1)
        r = inorm * inv_intra                    # per-row norm after intra-norm
        gnorm = jnp.sqrt(jnp.sum(r * r))         # == ||intra-normalized vlad||
        inv_g = 1.0 / jnp.maximum(gnorm, eps)
        o_ref[0] = (vlad * (inv_intra * inv_g)).astype(o_ref.dtype)


def _round_up(x, m):
    return (x + m - 1) // m * m


_TILE_CANDIDATES = (4096, 2048, 1024, 512, 256, 128)
_TILE_BUDGET_BYTES = 28 * 1024 * 1024     # per-tile working-set budget
_VMEM_LIMIT_BYTES = 48 * 1024 * 1024      # <= 48 MiB keeps headroom on v7x's 64 MiB


def _tile_footprint_bytes(ts, C, K, x_itemsize, mxu_itemsize, n_buf):
    """Rough VMEM footprint of one spatial tile configuration."""
    return (n_buf * C * ts * x_itemsize           # pipelined x window
            + C * ts * (4 + mxu_itemsize)         # f32 + mxu-dtype tile copies
            + 4 * K * ts * 4                      # logits / e / a / a_scaled
            + 2 * K * C * 4)                      # accumulators


def _choose_spatial_tiling(S, C, K, x_itemsize, mxu_itemsize, n_buf):
    """Return (tile_s, padded_S). tile_s is a multiple of 128 dividing padded_S."""
    cap = 128
    for cand in _TILE_CANDIDATES:
        if _tile_footprint_bytes(cand, C, K, x_itemsize, mxu_itemsize,
                                 n_buf) <= _TILE_BUDGET_BYTES:
            cap = cand
            break
    s128 = _round_up(S, 128)
    if s128 <= cap:
        return s128, s128                         # single (possibly padded) tile
    if S % 128 == 0:
        for cand in _TILE_CANDIDATES:
            if cand <= cap and S % cand == 0:
                return cand, S                    # exact tiling, no padding
    return cap, _round_up(S, cap)                 # pad + mask in-kernel


def netvlad_forward(x_nchw, conv_w, centroids, *, mxu_dtype=None,
                    x_buffer_count=2):
    """x_nchw: (N, C, H, W); conv_w: (K, C); centroids: (K, C) -> (N, K*C).

    For best HBM efficiency pass bf16 activations (x_nchw) from the producer;
    the kernel keeps all reductions / normalization in f32 internally.
    On v7x, sweep x_buffer_count in {2, 3}.
    """
    N, C, H, W = x_nchw.shape
    K = conv_w.shape[0]
    S = H * W

    # bf16 MXU operands (f32 accumulation) at production channel counts; keep
    # f32 matmuls + exact reciprocals at tiny C so the 1e-5 demo check holds.
    production = C >= 128
    if mxu_dtype is None:
        mxu_dtype = jnp.bfloat16 if production else jnp.float32

    x_itemsize = jnp.dtype(x_nchw.dtype).itemsize
    mxu_itemsize = jnp.dtype(mxu_dtype).itemsize
    ts, s_pad = _choose_spatial_tiling(S, C, K, x_itemsize, mxu_itemsize,
                                       x_buffer_count)
    num_s_tiles = s_pad // ts

    # Free, contiguous reshape -- no HBM transpose pass.
    x_ncs = x_nchw.reshape(N, C, S)
    if s_pad != S:
        # Extra HBM copy only for non-128-multiple spatial sizes; padded
        # columns are zero and masked out of the accumulation in-kernel.
        x_ncs = jnp.pad(x_ncs, ((0, 0), (0, 0), (0, s_pad - S)))

    # Cast the weights once in HBM instead of per grid step; centroids stay f32.
    conv_w_m = conv_w.astype(mxu_dtype)
    centroids_f = centroids.astype(jnp.float32)

    kernel = functools.partial(
        _netvlad_kernel, mxu_dtype=mxu_dtype, valid_s=S, tile_s=ts,
        needs_mask=(s_pad != S), approx=production)

    x_spec_kwargs = {}
    if x_buffer_count != 2:
        x_spec_kwargs["pipeline_mode"] = pl.Buffered(x_buffer_count)

    out = pl.pallas_call(
        kernel,
        out_shape=jax.ShapeDtypeStruct((N, K, C), x_nchw.dtype),
        grid_spec=pltpu.PrefetchScalarGridSpec(
            num_scalar_prefetch=0,
            grid=(N, num_s_tiles),
            in_specs=[
                pl.BlockSpec((1, C, ts), lambda n, s: (n, 0, s), **x_spec_kwargs),
                pl.BlockSpec((K, C), lambda n, s: (0, 0)),
                pl.BlockSpec((K, C), lambda n, s: (0, 0)),
            ],
            out_specs=pl.BlockSpec((1, K, C), lambda n, s: (n, 0, 0)),
            scratch_shapes=[
                pltpu.VMEM((K, C), jnp.float32),   # a @ x_n^T accumulator
                pltpu.VMEM((K, 1), jnp.float32),   # sum_s a accumulator
            ],
        ),
        compiler_params=pltpu.CompilerParams(
            dimension_semantics=("parallel", "arbitrary"),
            vmem_limit_bytes=_VMEM_LIMIT_BYTES,
        ),
    )(x_ncs, conv_w_m, centroids_f)

    # (N, K, C) -> (N, K*C) is a free contiguous reshape (matches vlad.view).
    return out.reshape(N, K * C)


def netvlad_reference(x_nchw, conv_w, centroids):
    """Pure-JAX reference mirroring the PyTorch forward (vladv1)."""
    N, C, H, W = x_nchw.shape
    eps = 1e-12
    nrm = jnp.sqrt(jnp.sum(x_nchw * x_nchw, axis=1, keepdims=True))
    x = x_nchw / jnp.maximum(nrm, eps)
    sa = jnp.einsum('nchw,kc->nkhw', x, conv_w).reshape(N, conv_w.shape[0], -1)
    sa = jax.nn.softmax(sa, axis=1)                      # (N, K, S)
    xf = x.reshape(N, C, -1)                             # (N, C, S)
    vlad = (jnp.einsum('nks,ncs->nkc', sa, xf)
            - centroids[None, :, :] * jnp.sum(sa, axis=-1)[:, :, None])
    inorm = jnp.sqrt(jnp.sum(vlad * vlad, axis=2, keepdims=True))
    vlad = vlad / jnp.maximum(inorm, eps)
    vlad = vlad.reshape(N, -1)
    gnorm = jnp.sqrt(jnp.sum(vlad * vlad, axis=1, keepdims=True))
    return vlad / jnp.maximum(gnorm, eps)


if __name__ == "__main__":
    kx, kw, kc, kx2, kw2, kc2 = jax.random.split(jax.random.PRNGKey(0), 6)

    # --- Check 1: small f32 path (also exercises spatial padding + masking:
    #     S = 8*8 = 64 is padded to 128 and the padded columns are masked).
    N, C, H, W, K = 2, 16, 8, 8, 8
    x = jax.random.normal(kx, (N, C, H, W), dtype=jnp.float32)
    # nn.Conv2d(dim, K, 1, bias=False) weight: (K, C, 1, 1) -> squeeze to (K, C)
    conv_w = (jax.random.uniform(kw, (K, C, 1, 1), dtype=jnp.float32,
                                 minval=-1.0, maxval=1.0) / jnp.sqrt(C)
              ).reshape(K, C)
    centroids = jax.random.uniform(kc, (K, C), dtype=jnp.float32)  # torch.rand(K, dim)

    out = jax.block_until_ready(netvlad_forward(x, conv_w, centroids))
    ref = netvlad_reference(x, conv_w, centroids)
    assert out.shape == (N, K * C)
    assert jnp.allclose(out, ref, atol=1e-5, rtol=1e-5), "f32 mismatch vs reference"

    # --- Check 2: production-style path (bf16 x stream, bf16 MXU operands,
    #     EUP rsqrt / approx reciprocal) against an f32 reference.
    N2, C2, H2, W2, K2 = 2, 128, 16, 16, 16
    x2 = jax.random.normal(kx2, (N2, C2, H2, W2),
                           dtype=jnp.float32).astype(jnp.bfloat16)
    conv_w2 = (jax.random.uniform(kw2, (K2, C2, 1, 1), dtype=jnp.float32,
                                  minval=-1.0, maxval=1.0) / jnp.sqrt(C2)
               ).reshape(K2, C2)
    centroids2 = jax.random.uniform(kc2, (K2, C2), dtype=jnp.float32)

    out2 = jax.block_until_ready(netvlad_forward(x2, conv_w2, centroids2))
    ref2 = netvlad_reference(x2.astype(jnp.float32), conv_w2, centroids2)
    assert out2.shape == (N2, K2 * C2)
    assert jnp.allclose(out2.astype(jnp.float32), ref2, atol=2e-2, rtol=2e-2), \
        "bf16 mismatch vs reference"

    print("KERNEL_OK")
</pallas_src>

<mosaic_0001>
module attributes {stable_mosaic.version = 11 : i64} {
  func.func @_netvlad_kernel(%arg0: i32, %arg1: i32, %arg2: memref<1x16x128xf32, #tpu.memory_space<vmem>>, %arg3: memref<8x16xf32, #tpu.memory_space<vmem>>, %arg4: memref<8x16xf32, #tpu.memory_space<vmem>>, %arg5: memref<1x8x16xf32, #tpu.memory_space<vmem>>, %arg6: memref<8x16xf32, #tpu.memory_space<vmem>>, %arg7: memref<8x1xf32, #tpu.memory_space<vmem>>) attributes {dimension_semantics = [#tpu.dimension_semantics<parallel>, #tpu.dimension_semantics<arbitrary>], iteration_bounds = array<i64: 2, 1>, scalar_prefetch = 0 : i64, scratch_operands = 2 : i64, tpu.core_type = #tpu.core_type<tc>, window_params = [{transform_indices = @transform_0, window_bounds = array<i64: 1, 16, 128>}, {pipeline_mode = #tpu.pipeline_mode<synchronous>, transform_indices = @transform_1, window_bounds = array<i64: 8, 16>}, {pipeline_mode = #tpu.pipeline_mode<synchronous>, transform_indices = @transform_2, window_bounds = array<i64: 8, 16>}, {transform_indices = @transform_3, window_bounds = array<i64: 1, 8, 16>}]} {
    %c0_i32 = arith.constant 0 : i32
    %0 = arith.cmpi eq, %arg1, %c0_i32 : i32
    %1 = arith.extui %0 : i1 to i32
    %c0_i32_0 = arith.constant 0 : i32
    %2 = arith.cmpi ne, %1, %c0_i32_0 : i32
    scf.if %2 {
      %cst_25 = arith.constant 0.000000e+00 : f32
      %50 = vector.broadcast %cst_25 : f32 to vector<8x16xf32>
      %c0_26 = arith.constant 0 : index
      %c0_27 = arith.constant 0 : index
      %51 = vector.load %arg6[%c0_26, %c0_27] : memref<8x16xf32, #tpu.memory_space<vmem>>, vector<8x16xf32>
      tpu.vector_store %arg6[%c0_26, %c0_27], %50 {strides = array<i32>} : memref<8x16xf32, #tpu.memory_space<vmem>>, vector<8x16xf32>,
      %cst_28 = arith.constant 0.000000e+00 : f32
      %52 = vector.broadcast %cst_28 : f32 to vector<8x1xf32>
      %c0_29 = arith.constant 0 : index
      %c0_30 = arith.constant 0 : index
      %53 = vector.load %arg7[%c0_29, %c0_30] : memref<8x1xf32, #tpu.memory_space<vmem>>, vector<8x1xf32>
      tpu.vector_store %arg7[%c0_29, %c0_30], %52 {strides = array<i32>} : memref<8x1xf32, #tpu.memory_space<vmem>>, vector<8x1xf32>,
    } else {
    }
    %c0 = arith.constant 0 : index
    %c0_1 = arith.constant 0 : index
    %c0_2 = arith.constant 0 : index
    %3 = vector.load %arg2[%c0, %c0_1, %c0_2] : memref<1x16x128xf32, #tpu.memory_space<vmem>>, vector<1x16x128xf32>
    %4 = vector.shape_cast %3 : vector<1x16x128xf32> to vector<16x128xf32>
    %5 = arith.mulf %4, %4 : vector<16x128xf32>
    %cst = arith.constant dense<0.000000e+00> : vector<128xf32>
    %6 = vector.multi_reduction <add>, %5, %cst [0] : vector<16x128xf32> to vector<128xf32>
    %7 = vector.shape_cast %6 : vector<128xf32> to vector<1x128xf32>
    %8 = math.sqrt %7 : vector<1x128xf32>
    %cst_3 = arith.constant 9.99999996E-13 : f32
    %9 = vector.broadcast %cst_3 : f32 to vector<1x128xf32>
    %10 = arith.maximumf %8, %9 : vector<1x128xf32>
    %cst_4 = arith.constant 1.000000e+00 : f32
    %11 = vector.broadcast %cst_4 : f32 to vector<1x128xf32>
    %12 = arith.divf %11, %10 : vector<1x128xf32>
    %c0_5 = arith.constant 0 : index
    %c0_6 = arith.constant 0 : index
    %13 = vector.load %arg3[%c0_5, %c0_6] : memref<8x16xf32, #tpu.memory_space<vmem>>, vector<8x16xf32>
    %cst_7 = arith.constant dense<0.000000e+00> : vector<8x128xf32>
    %14 = tpu.matmul %13, %4, %cst_7 {dimension_numbers = #tpu.dot_dimension_numbers<[1], [0], [0], [1], [0, 0, 1, 1], [], []>} : vector<8x16xf32>, vector<16x128xf32>, vector<8x128xf32> -> vector<8x128xf32>
    %15 = vector.broadcast %12 : vector<1x128xf32> to vector<8x128xf32>
    %16 = arith.mulf %14, %15 : vector<8x128xf32>
    %cst_8 = arith.constant dense<0xFF800000> : vector<128xf32>
    %17 = vector.multi_reduction <maximumf>, %16, %cst_8 [0] : vector<8x128xf32> to vector<128xf32>
    %18 = vector.shape_cast %17 : vector<128xf32> to vector<1x128xf32>
    %19 = vector.broadcast %18 : vector<1x128xf32> to vector<8x128xf32>
    %20 = arith.subf %16, %19 : vector<8x128xf32>
    %21 = math.exp %20 : vector<8x128xf32>
    %cst_9 = arith.constant dense<0.000000e+00> : vector<128xf32>
    %22 = vector.multi_reduction <add>, %21, %cst_9 [0] : vector<8x128xf32> to vector<128xf32>
    %23 = vector.shape_cast %22 : vector<128xf32> to vector<1x128xf32>
    %cst_10 = arith.constant 1.000000e+00 : f32
    %24 = vector.broadcast %cst_10 : f32 to vector<1x128xf32>
    %25 = arith.divf %24, %23 : vector<1x128xf32>
    %26 = vector.broadcast %25 : vector<1x128xf32> to vector<8x128xf32>
    %27 = arith.mulf %21, %26 : vector<8x128xf32>
    %c128_i32 = arith.constant 128 : i32
    %28 = arith.muli %arg1, %c128_i32 : i32
    %29 = tpu.iota {dimensions = array<i32: 1>} : vector<8x128xi32>
    %30 = vector.broadcast %28 : i32 to vector<8x128xi32>
    %31 = arith.addi %30, %29 : vector<8x128xi32>
    %c64_i32 = arith.constant 64 : i32
    %32 = vector.broadcast %c64_i32 : i32 to vector<8x128xi32>
    %33 = arith.cmpi slt, %31, %32 : vector<8x128xi32>
    %cst_11 = arith.constant 0.000000e+00 : f32
    %34 = vector.broadcast %cst_11 : f32 to vector<8x128xf32>
    %35 = arith.select %33, %27, %34 : vector<8x128xi1>, vector<8x128xf32>
    %36 = vector.broadcast %12 : vector<1x128xf32> to vector<8x128xf32>
    %37 = arith.mulf %35, %36 : vector<8x128xf32>
    %c0_12 = arith.constant 0 : index
    %c0_13 = arith.constant 0 : index
    %38 = vector.load %arg6[%c0_12, %c0_13] : memref<8x16xf32, #tpu.memory_space<vmem>>, vector<8x16xf32>
    %cst_14 = arith.constant dense<0.000000e+00> : vector<8x16xf32>
    %39 = tpu.matmul %37, %4, %cst_14 {dimension_numbers = #tpu.dot_dimension_numbers<[1], [1], [0], [0], [0, 0, 1, 0], [], []>} : vector<8x128xf32>, vector<16x128xf32>, vector<8x16xf32> -> vector<8x16xf32>
    %40 = arith.addf %38, %39 : vector<8x16xf32>
    %c0_15 = arith.constant 0 : index
    %c0_16 = arith.constant 0 : index
    %41 = vector.load %arg6[%c0_15, %c0_16] : memref<8x16xf32, #tpu.memory_space<vmem>>, vector<8x16xf32>
    tpu.vector_store %arg6[%c0_15, %c0_16], %40 {strides = array<i32>} : memref<8x16xf32, #tpu.memory_space<vmem>>, vector<8x16xf32>,
    %c0_17 = arith.constant 0 : index
    %c0_18 = arith.constant 0 : index
    %42 = vector.load %arg7[%c0_17, %c0_18] : memref<8x1xf32, #tpu.memory_space<vmem>>, vector<8x1xf32>
    %cst_19 = arith.constant dense<0.000000e+00> : vector<8xf32>
    %43 = vector.multi_reduction <add>, %35, %cst_19 [1] : vector<8x128xf32> to vector<8xf32>
    %44 = vector.shape_cast %43 : vector<8xf32> to vector<8x1xf32>
    %45 = arith.addf %42, %44 : vector<8x1xf32>
    %c0_20 = arith.constant 0 : index
    %c0_21 = arith.constant 0 : index
    %46 = vector.load %arg7[%c0_20, %c0_21] : memref<8x1xf32, #tpu.memory_space<vmem>>, vector<8x1xf32>
    tpu.vector_store %arg7[%c0_20, %c0_21], %45 {strides = array<i32>} : memref<8x1xf32, #tpu.memory_space<vmem>>, vector<8x1xf32>,
    %c0_i32_22 = arith.constant 0 : i32
    %47 = arith.cmpi eq, %arg1, %c0_i32_22 : i32
    %48 = arith.extui %47 : i1 to i32
    %cst_23 = arith.constant 9.99999996E-13 : f32
    %c0_i32_24 = arith.constant 0 : i32
    %49 = arith.cmpi ne, %48, %c0_i32_24 : i32
    scf.if %49 {
      %c0_25 = arith.constant 0 : index
      %c0_26 = arith.constant 0 : index
      %50 = vector.load %arg4[%c0_25, %c0_26] : memref<8x16xf32, #tpu.memory_space<vmem>>, vector<8x16xf32>
      %c0_27 = arith.constant 0 : index
      %c0_28 = arith.constant 0 : index
      %51 = vector.load %arg6[%c0_27, %c0_28] : memref<8x16xf32, #tpu.memory_space<vmem>>, vector<8x16xf32>
      %c0_29 = arith.constant 0 : index
      %c0_30 = arith.constant 0 : index
      %52 = vector.load %arg7[%c0_29, %c0_30] : memref<8x1xf32, #tpu.memory_space<vmem>>, vector<8x1xf32>
      %53 = vector.broadcast %52 : vector<8x1xf32> to vector<8x16xf32>
      %54 = arith.mulf %50, %53 : vector<8x16xf32>
      %55 = arith.subf %51, %54 : vector<8x16xf32>
      %56 = arith.mulf %55, %55 : vector<8x16xf32>
      %cst_31 = arith.constant dense<0.000000e+00> : vector<8xf32>
      %57 = vector.multi_reduction <add>, %56, %cst_31 [1] : vector<8x16xf32> to vector<8xf32>
      %58 = vector.shape_cast %57 : vector<8xf32> to vector<8x1xf32>
      %59 = math.sqrt %58 : vector<8x1xf32>
      %60 = vector.broadcast %cst_23 : f32 to vector<8x1xf32>
      %61 = arith.maximumf %59, %60 : vector<8x1xf32>
      %cst_32 = arith.constant 1.000000e+00 : f32
      %62 = vector.broadcast %cst_32 : f32 to vector<8x1xf32>
      %63 = arith.divf %62, %61 : vector<8x1xf32>
      %64 = arith.mulf %59, %63 : vector<8x1xf32>
      %65 = arith.mulf %64, %64 : vector<8x1xf32>
      %66 = vector.shape_cast %65 : vector<8x1xf32> to vector<1x8x1xf32>
      %cst_33 = arith.constant dense<0.000000e+00> : vector<1xf32>
      %67 = vector.multi_reduction <add>, %66, %cst_33 [1, 2] : vector<1x8x1xf32> to vector<1xf32>
      %68 = vector.shape_cast %67 : vector<1xf32> to vector<1x1x1xf32>
      %69 = vector.extract %68[0, 0, 0] : f32 from vector<1x1x1xf32>
      %70 = math.sqrt %69 : f32
      %71 = arith.maximumf %70, %cst_23 : f32
      %cst_34 = arith.constant 1.000000e+00 : f32
      %72 = arith.divf %cst_34, %71 : f32
      %73 = vector.broadcast %72 : f32 to vector<8x1xf32>
      %74 = arith.mulf %63, %73 : vector<8x1xf32>
      %75 = vector.broadcast %74 : vector<8x1xf32> to vector<8x16xf32>
      %76 = arith.mulf %55, %75 : vector<8x16xf32>
      %c0_35 = arith.constant 0 : index
      %c0_36 = arith.constant 0 : index
      %c0_37 = arith.constant 0 : index
      %77 = vector.load %arg5[%c0_35, %c0_36, %c0_37] : memref<1x8x16xf32, #tpu.memory_space<vmem>>, vector<1x8x16xf32>
      %78 = vector.shape_cast %77 : vector<1x8x16xf32> to vector<8x16xf32>
      %79 = vector.shape_cast %76 : vector<8x16xf32> to vector<1x8x16xf32>
      tpu.vector_store %arg5[%c0_35, %c0_36, %c0_37], %79 {strides = array<i32>} : memref<1x8x16xf32, #tpu.memory_space<vmem>>, vector<1x8x16xf32>,
    } else {
    }
    return
  }
  func.func @transform_0(%arg0: i32, %arg1: i32) -> (i32, i32, i32) {
    %c0_i32 = arith.constant 0 : i32
    %c0_i32_0 = arith.constant 0 : i32
    return %arg0, %c0_i32, %arg1 : i32, i32, i32
  }
  func.func @transform_1(%arg0: i32, %arg1: i32) -> (i32, i32) {
    %c0_i32 = arith.constant 0 : i32
    %c0_i32_0 = arith.constant 0 : i32
    %c0_i32_1 = arith.constant 0 : i32
    return %c0_i32, %c0_i32_0 : i32, i32
  }
  func.func @transform_2(%arg0: i32, %arg1: i32) -> (i32, i32) {
    %c0_i32 = arith.constant 0 : i32
    %c0_i32_0 = arith.constant 0 : i32
    %c0_i32_1 = arith.constant 0 : i32
    return %c0_i32, %c0_i32_0 : i32, i32
  }
  func.func @transform_3(%arg0: i32, %arg1: i32) -> (i32, i32, i32) {
    %c0_i32 = arith.constant 0 : i32
    %c0_i32_0 = arith.constant 0 : i32
    %c0_i32_1 = arith.constant 0 : i32
    return %arg0, %c0_i32, %c0_i32_0 : i32, i32, i32
  }
}

</mosaic_0001>

<bundles_post_ra>
// kernel: tpu_custom_call.1
= control target key start
LH: loop header
LB: loop body
LE: loop exit
PB: predicated region body
PF: predicated region fallthrough
CT: control target
= control target key end

     0   :  { %8 = vsyncpa [#allocation5], 0  ;;  %s1227_s0 = inlined_call_operand.hbm [shape: f32[2,16,128], index: 0, kind: input, shape index: {}]   ;;  %s1228_s1 = inlined_call_operand.hbm [shape: f32[8,16], index: 1, kind: input, shape index: {}]   ;;  %s1229_s2 = inlined_call_operand.hbm [shape: f32[8,16], index: 2, kind: input, shape index: {}]   ;;  %s1230_s3 = inlined_call_operand.hbm [shape: f32[2,8,16], index: 3, kind: output, shape index: {}]  }
   0x1   :  { %10 = vsyncpa [#allocation5 + $0x1], 0 }
   0x2   :  { %11 = vsyncpa [#allocation8], 0 }
   0x3   :  { %12 = vsyncpa [#allocation6], 0 }
   0x4   :  { %14 = vsyncpa [#allocation6 + $0x1], 0  ;;  %s972_s12 = smov 0   ;;  %s974_s13 = smov 0  }
   0x5   :  { %s976_s14 = smov 0   ;;  %s978_s15 = smov 0  }
   0x6   :  { %s980_s16 = smov 0   ;;  %s982_s17 = smov 0  }
   0x7 LB: > { %s608_s18 = sadd.s32 4294967295, %s939_s17   ;;  %s609_s19 = sadd.s32 4294967294, %s939_s17   ;;  %s939_s17 = sphi %s982_s17, %s20_s17   ;;  %s935_s16 = sphi %s980_s16, %s1256_s16   ;;  %s931_s15 = sphi %s978_s15, %s1255_s15   ;;  %s927_s14 = sphi %s976_s14, %s1254_s14   ;;  %s923_s13 = sphi %s974_s13, %s1253_s13   ;;  %s919_s12 = sphi %s972_s12, %s1252_s12  }
   0x8   : > { %s41_s20 = sadd.s32 1, %s927_s14  ;;  %p48_p0 = scmp.ne.s32.totalorder %s927_s14, %s923_s13 }
   0x9   : > { %p49_p1 = scmp.eq.s32.totalorder %s939_s17, 0  ;;  %p54_p2 = scmp.ne.s32.totalorder %s923_s13, %s919_s12 }
   0xa   : > { %p1010_p3 = scmp.eq.s32.totalorder %s608_s18, 0  ;;  %p120_p4 = scmp.eq.s32.totalorder %s608_s18, 1 }
   0xb   : > { %p1014_p5 = por %p49_p1, %p48_p0  ;;  %p126_p6 = scmp.eq.s32.totalorder %s609_s19, 1 }
   0xc   : > { %s1237_s21 = scalar_select %p1010_p3, 1, 0 }
   0xd   : > { %p1020_p7 = por %p1010_p3, %p54_p2  ;;  %p1024_p8 = por %p120_p4, %p48_p0 }
   0xe   : > { %p1028_p9 = por %p126_p6, %p54_p2  ;;  %p610_p10 = scmp.ge.s32.totalorder %s939_s17, 1 }
   0xf   : > { %s1239_s23 = scalar_select %p1020_p7, 1, 0 }
  0x10   : > { %s1240_s24 = scalar_select %p1024_p8, 1, 0 }
  0x11   : > { %s1241_s25 = scalar_select %p1028_p9, 1, 0 }
  0x12   : > { %p133_p11 = scmp.lt.s32.totalorder %s939_s17, 3  ;;  %s941_s27 = smov [#allocation7]  }
  0x13   : > { %s146_s28 = sshll.u32 %s941_s27, 4  ;;  %p689_p1 = scmp.lt.s32.totalorder %s939_s17, 2  ;;  %s147_s28 = int_to_ptr.vmem [resolvable:$true] %s146_s28 }
  0x14   : > { %p1035_p13 = pnand %p610_p10, %p133_p11  ;;  %s942_s30 = smov [#allocation9]  }
  0x15   : > { %p1044_p4 = pnand %p689_p1, %p1014_p5  ;;  %s157_s4 = sshll.u32 %s942_s30, 4  ;;  %s1054_s4 = int_to_ptr.vmem [resolvable:$true] %s157_s4 }
  0x16   : > { %s1242_s26 = scalar_select %p1035_p13, 1, 0 }
  0x17   : > { %p672_p0 = pneg %p1035_p13  ;;  %s767_s8 = scalar_lea.hbm %s1228_s1, 128 }
  0x18   : > { %s1243_s29 = scalar_select %p1044_p4, 1, 0 }
  0x19   : > { %p1050_p2 = pnand %p672_p0, %p1010_p3  ;;  %p768_p5 = scmp.ne.s32.totalorder %s1228_s1, %s767_s8 }
  0x1a   : > { %p774_p1 = scmp.lt.u32.totalorder %s767_s8, %s1228_s1 }
  0x1b   : > { %p769_p6 = pneg %p1050_p2 }
  0x1d   : > { %p770_p10 = pnand %p769_p6, %p768_p5 }
  0x1f   : > { %p771_p11 = pneg %p770_p10 }
  0x21   : > { %p776_p0 = pnand %p774_p1, %p771_p11 }
  0x23   : > { %779 = shalt.err (!%p776_p0)
}
  0x24   : > { %s780_s19 = scalar_lea.vmem %s147_s28, 128  ;;  %p788_p3 = scmp.lt.s32.totalorder %s147_s28, %s147_s28 }
  0x25   : > { %p781_p12 = scmp.ne.s32.totalorder %s147_s28, %s780_s19  ;;  %p789_p7 = scmp.lt.s32.totalorder %s780_s19, %s780_s19 }
  0x27   : > { %p783_p9 = pnand %p781_p12, %p769_p6  ;;  %p790_p13 = por %p789_p7, %p788_p3 }
  0x29   : > { %p784_p8 = pneg %p783_p9 }
  0x2b   : > { %p791_p4 = pnand %p790_p13, %p784_p8 }
  0x2d   : > { %794 = shalt.err (!%p791_p4)
}
  0x2e   : > { %675 = dma.hbm_to_vmem [thread:$0]  (!%p1050_p2), %s1228_s1, 128, %s147_s28, [#allocation8]  }
  0x2f   : > { %s795_s7 = scalar_lea.hbm %s1229_s2, 128 }
  0x30   : > { %p796_p9 = scmp.ne.s32.totalorder %s1229_s2, %s795_s7  ;;  %p802_p8 = scmp.lt.u32.totalorder %s795_s7, %s1229_s2 }
  0x32   : > { %p798_p3 = pnand %p796_p9, %p769_p6 }
  0x34   : > { %p799_p7 = pneg %p798_p3 }
  0x36   : > { %p804_p12 = pnand %p802_p8, %p799_p7 }
  0x38   : > { %807 = shalt.err (!%p804_p12)
}
  0x39   : > { %s808_s28 = scalar_lea.vmem %s1054_s4, 128  ;;  %p816_p10 = scmp.lt.s32.totalorder %s1054_s4, %s1054_s4 }
  0x3a   : > { %p809_p13 = scmp.ne.s32.totalorder %s1054_s4, %s808_s28  ;;  %p817_p11 = scmp.lt.s32.totalorder %s808_s28, %s808_s28 }
  0x3c   : > { %p811_p4 = pnand %p809_p13, %p769_p6  ;;  %p818_p1 = por %p817_p11, %p816_p10 }
  0x3e   : > { %p812_p5 = pneg %p811_p4 }
  0x40   : > { %p819_p0 = pnand %p818_p1, %p812_p5 }
  0x42   : > { %822 = shalt.err (!%p819_p0)
}
  0x43   : > { %678 = dma.hbm_to_vmem [thread:$0]  (!%p1050_p2), %s1229_s2, 128, %s1054_s4, [#allocation8]  }
  0x44   : > { %s32_s22 = sadd.s32 1, %s935_s16  ;;  %s168_s27 = sand.u32 1, %s927_s14  }
  0x45   : > { %p34_p6 = scmp.ge.s32.totalorder %s32_s22, 2  ;;  %s614_s30 = sshll.u32 %s168_s27, 4 }
  0x46   : > { %s627_s6 = sshll.u32 %s935_s16, 8  ;;  %s172_s4 = scalar_lea.vmem [#allocation4], %s614_s30 }
  0x47   : > { %s1258_s22 = smov (%p34_p6, %s32_s22), 0  ;;  %s1111_s8 = scalar_lea.hbm %s1227_s0, %s627_s6 }
  0x48   : > { %s36_s9 = ssub.s32 %s935_s16, %s1258_s22  ;;  %s180_s10 = sshll.u32 %s172_s4, 4  ;;  %s1115_s10 = int_to_ptr.vmem [resolvable:$true] %s180_s10 }
  0x49   : > { %p39_p2 = scmp.eq.s32.totalorder %s36_s9, 0  ;;  %s1122_s28 = scalar_lea.sflag [#allocation5], %s168_s27 }
  0x4a   : > { %s823_s18 = scalar_lea.hbm %s1111_s8, 256  ;;  %p1245_p3 = scmp.ne.s32.totalorder %s1243_s29, 0 }
  0x4b   : > { %s1120_s11 = scalar_select %p39_p2, %s927_s14, %s41_s20  }
  0x4c   : > { %p824_p9 = scmp.ne.s32.totalorder %s1111_s8, %s823_s18  ;;  %p825_p7 = pneg %p1245_p3 }
  0x4d   : > { %s828_s30 = scalar_lea.hbm %s1227_s0, 512  ;;  %p829_p13 = scmp.lt.u32.totalorder %s1111_s8, %s1227_s0 }
  0x4e   : > { %p826_p8 = pnand %p825_p7, %p824_p9  ;;  %p830_p4 = scmp.lt.u32.totalorder %s828_s30, %s823_s18 }
  0x4f   : > { %p832_p10 = scmp.lt.u32.totalorder %s823_s18, %s1111_s8 }
  0x50   : > { %p827_p12 = pneg %p826_p8  ;;  %p831_p5 = por %p830_p4, %p829_p13 }
  0x52   : > { %p833_p11 = por %p832_p10, %p831_p5 }
  0x54   : > { %p834_p1 = pnand %p833_p11, %p827_p12 }
  0x56   : > { %837 = shalt.err (!%p834_p1)
}
  0x57   : > { %s838_s20 = scalar_lea.vmem %s1115_s10, 256  ;;  %s943_s27 = smov [#allocation4]  }
  0x58   : > { %p839_p0 = scmp.ne.s32.totalorder %s1115_s10, %s838_s20  ;;  %s843_s9 = sshll.u32 %s943_s27, 4  ;;  %s844_s9 = int_to_ptr.vmem [resolvable:$false] %s843_s9 }
  0x59   : > { %s845_s4 = scalar_lea.vmem %s844_s9, 512  ;;  %p846_p9 = scmp.lt.s32.totalorder %s1115_s10, %s844_s9 }
  0x5a   : > { %p841_p6 = pnand %p839_p0, %p825_p7  ;;  %p847_p8 = scmp.lt.s32.totalorder %s845_s4, %s838_s20 }
  0x5c   : > { %p842_p2 = pneg %p841_p6  ;;  %p848_p13 = por %p847_p8, %p846_p9 }
  0x5e   : > { %p849_p4 = pnand %p848_p13, %p842_p2 }
  0x60   : > { %852 = shalt.err (!%p849_p4)
}
  0x61   : > { %s944_s18 = smov 128   ;;  %s945_s19 = smov 8  }
  0x62   : > { %682 = dma.hbm_to_vmem [thread:$0]  (!%p1245_p3), %s1111_s8, 256, %s1115_s10, %s1122_s28, %s944_s18, %s944_s18, %s945_s19  }
  0x63   : > { %p1246_p7 = scmp.ne.s32.totalorder %s1242_s26, 0 }
  0x64   : > { %s1153_s6 = sand.u32 (!%p1246_p7), 1, %s923_s13   ;;  %p1247_p12 = scmp.ne.s32.totalorder (!%p1246_p7), %s1239_s23, 0 }
  0x65   : > { %192 = sbr.rel (%p1246_p7) target bundleno = 1201 (0x4b1), region = 32  ;;  %s618_s30 = sshll.u32 (!%p1246_p7), %s1153_s6, 4 }
  0x66   : > { %s195_s5 = scalar_lea.sflag (!%p1246_p7), [#allocation5], %s1153_s6  ;;  %s198_s7 = scalar_lea.vmem (!%p1246_p7), [#allocation4], %s618_s30 }
  0x6c   : > { %906 = dma.done.wait (%p1247_p12), %s195_s5, 256  }
  0x6d   : > { %908 = vsyncadd (%p1247_p12), %s195_s5, 4294967040  ;;  %p1248_p5 = scmp.ne.s32.totalorder %s1237_s21, 0 }
  0x6f   : > { %910 = dma.done.wait (%p1248_p5), [#allocation8], 256  }
  0x70   : > { %912 = vsyncadd (%p1248_p5), [#allocation8], 4294967040  ;;  %vm235_vm0 = vcmask 7168   ;;  %v946_v0 = vmov 0.0|0.0   ;;  %v947_v1 = vmov 0.0   ;;  %vm948_vm1 = vmmov 0  }
  0x71   : > { %648 = vmatprep.subr.bf16.mxu0 %v946_v0  ;;  %236 = vst.msk [vmem:[#allocation3] sm:$0xff] %vm235_vm0, %v947_v1  ;;  %638 = vmatprep.mubr.msk.f32.mxu0 %vm948_vm1, %v947_v1  ;;  %vm233_vm2 = vcmask 130048   ;;  %v237_v2 = vld [vmem:[%s198_s7] sm:$0xff]  ;;  %v238_v3 = vld [vmem:[%s198_s7 + $0x8] sm:$0xff]  ;;  %v353_v40 = vlaneseq  ;;  %v949_v46 = vmov 0   ;;  %s621_s8 = sshll.u32 %s1153_s6, 3 }
  0x72   : > { %234 = vst.msk [vmem:[#allocation2] sm:$0xff] %vm233_vm2, %v947_v1  ;;  %651 = vmatprep.subr.bf16.mxu1 %v946_v0  ;;  %645 = vmatprep.mubr.msk.f32.mxu1 %vm948_vm1, %v947_v1  ;;  %v239_v4 = vmul.f32 %v237_v2, %v237_v2  ;;  %v240_v5 = vmul.f32 %v238_v3, %v238_v3  ;;  %v258_v8 = vld [vmem:[#allocation7] sm:$0xff]  ;;  %v442_v55 = vld [vmem:[#allocation9] sm:$0xff]  ;;  %s950_s26 = smov 1e-12   ;;  %s624_s28 = sshll.u32 %s931_s15, 7 }
  0x73   : > { %v649_v6 = vpack.c.bf16 %v238_v3, %v237_v2  ;;  %v354_v41 = vand.u32 127, %v353_v40  ;;  %750 = vset.pattern.permute.xlu0 %v949_v46  ;;  %s228_s20 = scalar_lea.vmem [#allocation10], %s621_s8  ;;  %s1177_s18 = scalar_lea.hbm %s1230_s3, %s624_s28 }
  0x74   : > { %v241_v7 = vadd.f32 %v240_v5, %v239_v4  ;;  %s509_s27 = sshll.u32 %s228_s20, 4  ;;  %s496_s19 = scalar_lea.sflag [#allocation6], %s1153_s6  ;;  %s1179_s27 = int_to_ptr.vmem [resolvable:$true] %s509_s27 }
  0x75   : > { %650 = vmatpush3.bf16.msra.mxu0 %v649_v6  ;;  %653 = vmatpush3.bf16.xpose.msra.mxu1 %v649_v6  ;;  %vm357_vm5 = vcmp.lt.s32.totalorder %v354_v41, 64  ;;  %s853_s30 = scalar_lea.vmem %s1179_s27, 128  ;;  %p1249_p10 = scmp.ne.s32.totalorder %s1240_s24, 0 }
  0x76   : > { %v242_v9 = vrot.slane %v241_v7, 4  ;;  %p854_p3 = scmp.ne.s32.totalorder %s1179_s27, %s853_s30  ;;  %s951_s15 = smov [#allocation10]  }
  0x77   : > { %s857_s5 = sshll.u32 %s951_s15, 4  ;;  %s858_s5 = int_to_ptr.vmem [resolvable:$false] %s857_s5 }
  0x78   : > { %639 = vmatmul.mubr.msk.f32.vlgmr.msra.gmra.mrb[0].mxu0 %vm233_vm2, %v258_v8  ;;  %v243_v10 = vadd.f32 %v242_v9, %v241_v7  ;;  %v433_v47 = vld [vmem:[#allocation3] sm:$0xff]  ;;  %p855_p11 = pnand %p854_p3, %p1249_p10  ;;  %s859_s7 = scalar_lea.vmem %s858_s5, 256 }
  0x79   : > { %v360_v51 = vld [vmem:[#allocation2] sm:$0xff]  ;;  %p860_p0 = scmp.lt.s32.totalorder %s1179_s27, %s858_s5  ;;  %p861_p6 = scmp.lt.s32.totalorder %s859_s7, %s853_s30 }
  0x7a   : > { %v244_v11 = vrot.slane %v243_v10, 2  ;;  %p856_p1 = pneg %p855_p11 }
  0x7b   : > { %p862_p2 = por %p861_p6, %p860_p0 }
  0x7c   : > { %v245_v12 = vadd.f32 %v244_v11, %v243_v10 }
  0x7d   : > { %p863_p9 = pnand %p862_p2, %p856_p1 }
  0x7e   : > { %v246_v13 = vrot.slane %v245_v12, 1 }
  0x80   : > { %v247_v14 = vadd.f32 %v246_v13, %v245_v12 }
  0x82   : > { %751 = vrsqrt.f32 %v247_v14  ;;  %vm250_vm3 = vcmp.eq.f32.partialorder %v247_v14, inf  ;;  %v253_v17 = vand.u32 2147483648, %v247_v14  ;;  %vm252_vm4 = vcmp.eq.f32.partialorder %v247_v14, 0.0 }
  0x8c   : > { %v752_v15 = vpop.eup %751 }
  0x8d   : > { %v249_v16 = vmul.f32 %v752_v15, %v247_v14 }
  0x8f   : > { %v251_v18 = vsel %vm250_vm3, %v247_v14, %v249_v16 }
  0x90   : > { %v254_v19 = vsel %vm252_vm4, %v253_v17, %v251_v18 }
  0x91   : > { %v255_v20 = vmax.f32 %v254_v19, 1e-12 }
  0x93   : > { %753 = vrcp.f32 %v255_v20 }
  0x9d   : > { %v754_v21 = vpop.eup %753 }
 0x14b   : > { %v329_v22 = vpop.f32.mrb[0].mxu0 }
 0x14c   : > { %v333_v23 = vmul.f32 %v754_v21, %v329_v22  ;;  %v640_v24 = vpop.f32.mrb[1].mxu0 }
 0x14e   : > { %v334_v25 = vrot.slane %v333_v23, 4 }
 0x150   : > { %v335_v26 = vmax.f32 %v333_v23, %v334_v25 }
 0x152   : > { %v336_v27 = vrot.slane %v335_v26, 2 }
 0x154   : > { %v337_v28 = vmax.f32 %v335_v26, %v336_v27 }
 0x156   : > { %v338_v29 = vrot.slane %v337_v28, 1 }
 0x158   : > { %v339_v30 = vmax.f32 %v337_v28, %v338_v29 }
 0x15a   : > { %v340_v31 = vsub.f32 %v333_v23, %v339_v30 }
 0x15c   : > { %v341_v32 = vmul.f32 1.442695, %v340_v31 }
 0x15e   : > { %755 = vpow2.f32 %v341_v32 }
 0x168   : > { %v756_v33 = vpop.eup %755 }
 0x169   : > { %v343_v34 = vrot.slane %v756_v33, 4 }
 0x16b   : > { %v344_v35 = vadd.f32 %v756_v33, %v343_v34 }
 0x16d   : > { %v345_v36 = vrot.slane %v344_v35, 2 }
 0x16f   : > { %v346_v37 = vadd.f32 %v345_v36, %v344_v35 }
 0x171   : > { %v347_v38 = vrot.slane %v346_v37, 1 }
 0x173   : > { %v348_v39 = vadd.f32 %v347_v38, %v346_v37 }
 0x175   : > { %757 = vrcp.f32 %v348_v39 }
 0x17f   : > { %v758_v42 = vpop.eup %757 }
 0x180   : > { %v351_v43 = vmul.f32 %v758_v42, %v756_v33 }
 0x182   : > { %v358_v44 = vsel %vm357_vm5, %v351_v43, 0.0 }
 0x183   : > { %434 = vadd.xlane.f32.xlu0 %v358_v44  ;;  %v359_v45 = vmul.f32 %v754_v21, %v358_v44 }
 0x185   : > { %646 = vmatmul.mubr.f32.vlgmr.msra.gmra.mrb[0].mxu1 %v359_v45 }
 0x210   : > { %v435_v48 = vpop.xlane.xlu0 %434 }
 0x211   : > { %v436_v49 = vadd.f32 %v435_v48, %v433_v47 }
 0x213   : > { %438 = vst.msk [vmem:[#allocation3] sm:$0xff] %vm235_vm0, %v436_v49 }
 0x21a   : > { %v444_v50 = vld [vmem:[#allocation3] sm:$0xff] }
 0x21b   : > { %447 = vperm.xlu0 %750, %v444_v50  }
 0x258   : > { %v427_v52 = vpop.f32.mrb[0].mxu1 }
 0x259   : > { %v431_v53 = vadd.f32 %v427_v52, %v360_v51  ;;  %v647_v54 = vpop.f32.mrb[1].mxu1 }
 0x25b   : > { %432 = vst.msk [vmem:[#allocation2] sm:$0xff] %vm233_vm2, %v431_v53 }
 0x262   : > { %v443_v58 = vld [vmem:[#allocation2] sm:$0xff] }
 0x29a   : > { %v448_v56 = vpop.permute.xlu0 %447 }
 0x29b   : > { %v450_v57 = vmul.f32 %v448_v56, %v442_v55 }
 0x29d   : > { %v451_v59 = vsub.f32 %v443_v58, %v450_v57 }
 0x29f   : > { %v452_v60 = vmul.f32 %v451_v59, %v451_v59 }
 0x2a1   : > { %v453_v61 = vsel %vm233_vm2, %v452_v60, 0.0 }
 0x2a2   : > { %454 = vadd.xlane.f32.xlu1 %v453_v61 }
 0x32f   : > { %v455_v62 = vpop.xlane.xlu1 %454 }
 0x330   : > { %759 = vrsqrt.f32 %v455_v62  ;;  %vm458_vm6 = vcmp.eq.f32.partialorder %v455_v62, inf  ;;  %v461_v1 = vand.u32 2147483648, %v455_v62  ;;  %vm460_vm7 = vcmp.eq.f32.partialorder %v455_v62, 0.0 }
 0x33a   : > { %v760_v63 = vpop.eup %759 }
 0x33b   : > { %v457_v0 = vmul.f32 %v760_v63, %v455_v62 }
 0x33d   : > { %v459_v2 = vsel %vm458_vm6, %v455_v62, %v457_v0 }
 0x33e   : > { %v462_v3 = vsel %vm460_vm7, %v461_v1, %v459_v2 }
 0x33f   : > { %v463_v4 = vmax.f32 %v462_v3, 1e-12 }
 0x341   : > { %761 = vrcp.f32 %v463_v4 }
 0x34b   : > { %v762_v5 = vpop.eup %761 }
 0x34c   : > { %v466_v6 = vmul.f32 %v762_v5, %v462_v3 }
 0x34e   : > { %v467_v7 = vmul.f32 %v466_v6, %v466_v6 }
 0x350   : > { %v468_v8 = vsel %vm235_vm0, %v467_v7, 0.0 }
 0x351   : > { %469 = vadd.xlane.f32.xlu1 %v468_v8 }
 0x3de   : > { %v470_v9 = vpop.xlane.xlu1 %469 }
 0x3df   : > { %v471_v10 = vrot.slane %v470_v9, 4 }
 0x3e1   : > { %v472_v11 = vadd.f32 %v471_v10, %v470_v9 }
 0x3e3   : > { %v473_v12 = vrot.slane %v472_v11, 2 }
 0x3e5   : > { %v474_v13 = vadd.f32 %v473_v12, %v472_v11 }
 0x3e7   : > { %v475_v14 = vrot.slane %v474_v13, 1 }
 0x3e9   : > { %v476_v15 = vadd.f32 %v475_v14, %v474_v13 }
 0x3eb   : > { %654 = vpush %v476_v15 }
 0x41c   : > { %s655_s21 = spop %654 }
 0x41d   : > { %v478_v16 = vstv %s655_s21 }
 0x41e   : > { %763 = vrsqrt.f32 %v478_v16  ;;  %vm481_vm8 = vcmp.eq.f32.partialorder %v478_v16, inf  ;;  %v484_v19 = vand.u32 2147483648, %v478_v16  ;;  %vm483_vm9 = vcmp.eq.f32.partialorder %v478_v16, 0.0 }
 0x428   : > { %v764_v17 = vpop.eup %763 }
 0x429   : > { %v480_v18 = vmul.f32 %v764_v17, %v478_v16 }
 0x42b   : > { %v482_v20 = vsel %vm481_vm8, %v478_v16, %v480_v18 }
 0x42c   : > { %v485_v21 = vsel %vm483_vm9, %v484_v19, %v482_v20 }
 0x42d   : > { %656 = vpush %v485_v21 }
 0x45e   : > { %s657_s23 = spop %656 }
 0x45f   : > { %s487_s29 = smax.f32 %s950_s26, %s657_s23 }
 0x460   : > { %v488_v22 = vstv %s487_s29 }
 0x461   : > { %765 = vrcp.f32 %v488_v22 }
 0x46b   : > { %v766_v23 = vpop.eup %765 }
 0x46c   : > { %658 = vpush %v766_v23 }
 0x49d   : > { %s659_s10 = spop %658 }
 0x49e   : > { %v491_v24 = vstv %s659_s10 }
 0x49f   : > { %v492_v25 = vmul.f32 %v762_v5, %v491_v24 }
 0x4a1   : > { %v493_v26 = vmul.f32 %v492_v25, %v451_v59 }
 0x4a3   : > { %494 = vst.msk [vmem:[%s228_s20] sm:$0xff] %vm233_vm2, %v493_v26 }
 0x4a4   : > { %866 = shalt.err (!%p863_p9)
}
 0x4a5   : > { %s867_s6 = scalar_lea.hbm %s1177_s18, 128  ;;  %s871_s26 = scalar_lea.hbm %s1230_s3, 256 }
 0x4a6   : > { %p868_p8 = scmp.ne.s32.totalorder %s1177_s18, %s867_s6  ;;  %p872_p7 = scmp.lt.u32.totalorder %s1177_s18, %s1230_s3 }
 0x4a7   : > { %p873_p12 = scmp.lt.u32.totalorder %s871_s26, %s867_s6  ;;  %p875_p3 = scmp.lt.u32.totalorder %s867_s6, %s1177_s18 }
 0x4a8   : > { %p869_p13 = pnand %p868_p8, %p1249_p10 }
 0x4a9   : > { %p874_p5 = por %p873_p12, %p872_p7 }
 0x4aa   : > { %p870_p4 = pneg %p869_p13 }
 0x4ab   : > { %p876_p11 = por %p875_p3, %p874_p5 }
 0x4ad   : > { %p877_p1 = pnand %p876_p11, %p870_p4 }
 0x4af   : > { %880 = shalt.err (!%p877_p1)
}
 0x4b0   : > { %670 = dma.vmem_to_hbm [thread:$0]  (%p1249_p10), %s1179_s27, 128, %s1177_s18, %s496_s19  }
 0x4b1 PF: > { %s521_s10 = sand.u32 1, %s919_s12   ;;  %p1250_p0 = scmp.ne.s32.totalorder %s1241_s25, 0 }
 0x4b2   : > { %p1251_p6 = scmp.ge.s32.totalorder %s939_s17, 2  ;;  %s522_s28 = scalar_lea.sflag [#allocation6], %s521_s10 }
 0x4b4   : > { %p684_p2 = pnand %p1251_p6, %p1250_p0 }
 0x4b6   : > { %914 = dma.done.wait (!%p684_p2), %s522_s28, 128  }
 0x4b7   : > { %916 = vsyncadd (!%p684_p2), %s522_s28, 4294967168  ;;  %s20_s17 = sadd.s32 1, %s939_s17   ;;  %s1252_s12 = smov %s923_s13 }
 0x4b8   : > { %p17_p9 = scmp.ge.s32.totalorder %s20_s17, 4   ;;  %s1253_s13 = smov %s927_s14 }
 0x4b9   : > { %s1254_s14 = smov %s1120_s11  ;;  %s1255_s15 = smov %s935_s16 }
 0x4ba   : > { %s1256_s16 = smov %s1258_s22  ;;  %19 = sbr.rel (!%p17_p9) target bundleno = 7 (0x7), region = 93 }
 0x4c1   :  { %527 = vsyncpa [#allocation5], 1 }
 0x4c2   :  { %529 = vsyncpa [#allocation5 + $0x1], 1 }
 0x4c3   :  { %530 = vsyncpa [#allocation8], 1 }
 0x4c4   :  { %531 = vsyncpa [#allocation6], 1 }
 0x4c5   :  { %533 = vsyncpa [#allocation6 + $0x1], 1 }

</bundles_post_ra>
